<compile_context>
chip_gen: v6e
topology: v6e:2x2x1
jax: 0.10.0
libtpu: 0.0.40
codegen_flags: <defaults>
</compile_context>

<pallas_src>
import jax
import jax.numpy as jnp
from jax.experimental import pallas as pl
from jax.experimental.pallas import tpu as pltpu

H1, H2, OUT = 64, 32, 2


def _round_up(n, m):
    return ((n + m - 1) // m) * m


def _vmem_tile_bytes(rows, cols, itemsize=4):
    # VMEM footprint of a (rows, cols) f32 tile after (8, 128) layout padding.
    return _round_up(max(rows, 1), 8) * _round_up(max(cols, 1), 128) * itemsize


def mlp_kernel(x_ref, w1_ref, b1_ref, w2_ref, b2_ref, w3_ref, b3_ref, o_ref):
    # All-f32 path: the kernel is HBM-bandwidth bound, so full-precision MXU passes are free.
    x = x_ref[...]

    # Layer 1: Linear(D, 64) + ReLU
    h1 = jnp.dot(x, w1_ref[...], preferred_element_type=jnp.float32) + b1_ref[...]
    h1 = jnp.maximum(h1, 0.0)

    # Dropout(0.3): identity at inference time.
    # TODO(synk): training-mode dropout would need pltpu.prng_seed + pltpu.prng_random_bits mask.

    # Layer 2: Linear(64, 32) + ReLU
    h2 = jnp.dot(h1, w2_ref[...], preferred_element_type=jnp.float32) + b2_ref[...]
    h2 = jnp.maximum(h2, 0.0)

    # Layer 3: Linear(32, 2) -> narrow (TB, 2) output block (only 8 B/row written back to HBM).
    out = jnp.dot(h2, w3_ref[...], preferred_element_type=jnp.float32) + b3_ref[...]
    o_ref[...] = out.astype(o_ref.dtype)


def binary_classifier_forward(x, params, *, block_rows=2048):
    """x: [B, D] float32. params: w1,b1,w2,b2,w3,b3 (weights [in,out], biases [1,out])."""
    B, D = x.shape

    # ---- Batch tile selection --------------------------------------------------------------
    TB = _round_up(min(block_rows, B), 8)
    # Ensure >= 2 grid steps when the batch can be split, so the "parallel" batch axis
    # actually shards across the two TensorCores on v7x (no-op on single-TC v5e/v6e).
    if B > 16 and pl.cdiv(B, TB) < 2:
        TB = _round_up(pl.cdiv(B, 2), 8)

    # ---- Generation-aware VMEM budget (v7x: 64 MiB/TC; v5e/v6e: 128 MiB) --------------------
    try:
        vmem_cap = int(pltpu.get_tpu_info().vmem_capacity_bytes)
    except Exception:
        vmem_cap = 64 * 1024 * 1024  # safe lower bound across generations

    weight_vmem = (
        _vmem_tile_bytes(D, H1) + _vmem_tile_bytes(1, H1)
        + _vmem_tile_bytes(H1, H2) + _vmem_tile_bytes(1, H2)
        + _vmem_tile_bytes(H2, OUT) + _vmem_tile_bytes(1, OUT)
    )

    def tile_vmem(tb):
        return (
            2 * _vmem_tile_bytes(tb, D)       # double-buffered x tiles
            + 2 * _vmem_tile_bytes(tb, OUT)   # double-buffered output tiles
            + _vmem_tile_bytes(tb, H1)        # h1 intermediate
            + _vmem_tile_bytes(tb, H2)        # h2 intermediate
            + _vmem_tile_bytes(tb, OUT)       # layer-3 result before the store
            + 2 * weight_vmem                 # resident weights/biases (+ buffer slack)
        )

    budget = int(0.70 * vmem_cap)
    while TB > 8 and tile_vmem(TB) > budget:
        TB = max(8, _round_up(TB // 2, 8))

    grid = (pl.cdiv(B, TB),)
    vmem_needed = tile_vmem(TB)
    vmem_limit = int(min(int(0.85 * vmem_cap), max(16 * 1024 * 1024, 2 * vmem_needed)))

    # Weights/biases stay VMEM-resident across grid steps via constant index_maps.
    weight_spec = lambda arr: pl.BlockSpec(arr.shape, lambda i: (0, 0))

    # Advisory cost estimate (real OUT, real byte counts).
    flops = 2 * B * (D * H1 + H1 * H2 + H2 * OUT)
    bytes_accessed = (
        B * D * 4
        + (params["w1"].size + params["w2"].size + params["w3"].size) * 4
        + (params["b1"].size + params["b2"].size + params["b3"].size) * 4
        + B * OUT * 4
    )

    return pl.pallas_call(
        mlp_kernel,
        out_shape=jax.ShapeDtypeStruct((B, OUT), jnp.float32),
        grid=grid,
        in_specs=[
            pl.BlockSpec((TB, D), lambda i: (i, 0)),   # x: batch-tiled, full (unpadded) D
            weight_spec(params["w1"]), weight_spec(params["b1"]),
            weight_spec(params["w2"]), weight_spec(params["b2"]),
            weight_spec(params["w3"]), weight_spec(params["b3"]),
        ],
        out_specs=pl.BlockSpec((TB, OUT), lambda i: (i, 0)),
        compiler_params=pltpu.CompilerParams(
            dimension_semantics=("parallel",),
            vmem_limit_bytes=vmem_limit,
        ),
        cost_estimate=pl.CostEstimate(
            flops=int(flops), bytes_accessed=int(bytes_accessed), transcendentals=0),
    )(
        x.astype(jnp.float32),
        params["w1"].astype(jnp.float32), params["b1"].astype(jnp.float32),
        params["w2"].astype(jnp.float32), params["b2"].astype(jnp.float32),
        params["w3"].astype(jnp.float32), params["b3"].astype(jnp.float32),
    )


def init_params(key, input_dim):
    """Deterministic init mimicking PyTorch Linear default (uniform +/- 1/sqrt(fan_in))."""
    ks = jax.random.split(key, 6)

    def linear(kw, kb, fan_in, fan_out):
        bound = 1.0 / jnp.sqrt(fan_in)
        w = jax.random.uniform(kw, (fan_in, fan_out), jnp.float32, -bound, bound)
        b = jax.random.uniform(kb, (1, fan_out), jnp.float32, -bound, bound)
        return w, b

    w1, b1 = linear(ks[0], ks[1], input_dim, H1)
    w2, b2 = linear(ks[2], ks[3], H1, H2)
    w3, b3 = linear(ks[4], ks[5], H2, OUT)
    return {"w1": w1, "b1": b1, "w2": w2, "b2": b2, "w3": w3, "b3": b3}


if __name__ == "__main__":
    key = jax.random.PRNGKey(0)
    k_x, k_p = jax.random.split(key)

    batch, input_dim = 8, 32
    x = jax.random.normal(k_x, (batch, input_dim), jnp.float32)
    params = init_params(k_p, input_dim)

    out = jax.block_until_ready(binary_classifier_forward(x, params))

    # Pure-JAX f32 reference. Kernel is all-f32; tolerance covers MXU default-precision passes.
    h1 = jnp.maximum(x @ params["w1"] + params["b1"], 0.0)
    h2 = jnp.maximum(h1 @ params["w2"] + params["b2"], 0.0)
    ref = h2 @ params["w3"] + params["b3"]

    assert out.shape == (batch, 2)
    assert jnp.allclose(out, ref, atol=2e-2, rtol=2e-2), float(jnp.max(jnp.abs(out - ref)))

    print("KERNEL_OK")
</pallas_src>

<mosaic_0001>
module attributes {stable_mosaic.version = 11 : i64} {
  func.func @mlp_kernel(%arg0: i32, %arg1: memref<8x32xf32, #tpu.memory_space<vmem>>, %arg2: memref<32x64xf32, #tpu.memory_space<vmem>>, %arg3: memref<1x64xf32, #tpu.memory_space<vmem>>, %arg4: memref<64x32xf32, #tpu.memory_space<vmem>>, %arg5: memref<1x32xf32, #tpu.memory_space<vmem>>, %arg6: memref<32x2xf32, #tpu.memory_space<vmem>>, %arg7: memref<1x2xf32, #tpu.memory_space<vmem>>, %arg8: memref<8x2xf32, #tpu.memory_space<vmem>>) attributes {dimension_semantics = [#tpu.dimension_semantics<parallel>], iteration_bounds = array<i64: 1>, scalar_prefetch = 0 : i64, scratch_operands = 0 : i64, tpu.core_type = #tpu.core_type<tc>, window_params = [{transform_indices = @transform_0, window_bounds = array<i64: 8, 32>}, {pipeline_mode = #tpu.pipeline_mode<synchronous>, transform_indices = @transform_1, window_bounds = array<i64: 32, 64>}, {pipeline_mode = #tpu.pipeline_mode<synchronous>, transform_indices = @transform_2, window_bounds = array<i64: 1, 64>}, {pipeline_mode = #tpu.pipeline_mode<synchronous>, transform_indices = @transform_3, window_bounds = array<i64: 64, 32>}, {pipeline_mode = #tpu.pipeline_mode<synchronous>, transform_indices = @transform_4, window_bounds = array<i64: 1, 32>}, {pipeline_mode = #tpu.pipeline_mode<synchronous>, transform_indices = @transform_5, window_bounds = array<i64: 32, 2>}, {pipeline_mode = #tpu.pipeline_mode<synchronous>, transform_indices = @transform_6, window_bounds = array<i64: 1, 2>}, {transform_indices = @transform_7, window_bounds = array<i64: 8, 2>}]} {
    %c0 = arith.constant 0 : index
    %c0_0 = arith.constant 0 : index
    %0 = vector.load %arg1[%c0, %c0_0] : memref<8x32xf32, #tpu.memory_space<vmem>>, vector<8x32xf32>
    %c0_1 = arith.constant 0 : index
    %c0_2 = arith.constant 0 : index
    %1 = vector.load %arg2[%c0_1, %c0_2] : memref<32x64xf32, #tpu.memory_space<vmem>>, vector<32x64xf32>
    %cst = arith.constant dense<0.000000e+00> : vector<8x64xf32>
    %2 = tpu.matmul %0, %1, %cst {dimension_numbers = #tpu.dot_dimension_numbers<[1], [0], [0], [1], [0, 0, 1, 1], [], []>} : vector<8x32xf32>, vector<32x64xf32>, vector<8x64xf32> -> vector<8x64xf32>
    %c0_3 = arith.constant 0 : index
    %c0_4 = arith.constant 0 : index
    %3 = vector.load %arg3[%c0_3, %c0_4] : memref<1x64xf32, #tpu.memory_space<vmem>>, vector<1x64xf32>
    %4 = vector.broadcast %3 : vector<1x64xf32> to vector<8x64xf32>
    %5 = arith.addf %2, %4 : vector<8x64xf32>
    %cst_5 = arith.constant 0.000000e+00 : f32
    %6 = vector.broadcast %cst_5 : f32 to vector<8x64xf32>
    %7 = arith.maximumf %5, %6 : vector<8x64xf32>
    %c0_6 = arith.constant 0 : index
    %c0_7 = arith.constant 0 : index
    %8 = vector.load %arg4[%c0_6, %c0_7] : memref<64x32xf32, #tpu.memory_space<vmem>>, vector<64x32xf32>
    %cst_8 = arith.constant dense<0.000000e+00> : vector<8x32xf32>
    %9 = tpu.matmul %7, %8, %cst_8 {dimension_numbers = #tpu.dot_dimension_numbers<[1], [0], [0], [1], [0, 0, 1, 1], [], []>} : vector<8x64xf32>, vector<64x32xf32>, vector<8x32xf32> -> vector<8x32xf32>
    %c0_9 = arith.constant 0 : index
    %c0_10 = arith.constant 0 : index
    %10 = vector.load %arg5[%c0_9, %c0_10] : memref<1x32xf32, #tpu.memory_space<vmem>>, vector<1x32xf32>
    %11 = vector.broadcast %10 : vector<1x32xf32> to vector<8x32xf32>
    %12 = arith.addf %9, %11 : vector<8x32xf32>
    %cst_11 = arith.constant 0.000000e+00 : f32
    %13 = vector.broadcast %cst_11 : f32 to vector<8x32xf32>
    %14 = arith.maximumf %12, %13 : vector<8x32xf32>
    %c0_12 = arith.constant 0 : index
    %c0_13 = arith.constant 0 : index
    %15 = vector.load %arg6[%c0_12, %c0_13] : memref<32x2xf32, #tpu.memory_space<vmem>>, vector<32x2xf32>
    %cst_14 = arith.constant dense<0.000000e+00> : vector<8x2xf32>
    %16 = tpu.matmul %14, %15, %cst_14 {dimension_numbers = #tpu.dot_dimension_numbers<[1], [0], [0], [1], [0, 0, 1, 1], [], []>} : vector<8x32xf32>, vector<32x2xf32>, vector<8x2xf32> -> vector<8x2xf32>
    %c0_15 = arith.constant 0 : index
    %c0_16 = arith.constant 0 : index
    %17 = vector.load %arg7[%c0_15, %c0_16] : memref<1x2xf32, #tpu.memory_space<vmem>>, vector<1x2xf32>
    %18 = vector.broadcast %17 : vector<1x2xf32> to vector<8x2xf32>
    %19 = arith.addf %16, %18 : vector<8x2xf32>
    %c0_17 = arith.constant 0 : index
    %c0_18 = arith.constant 0 : index
    %20 = vector.load %arg8[%c0_17, %c0_18] : memref<8x2xf32, #tpu.memory_space<vmem>>, vector<8x2xf32>
    tpu.vector_store %arg8[%c0_17, %c0_18], %19 {strides = array<i32>} : memref<8x2xf32, #tpu.memory_space<vmem>>, vector<8x2xf32>,
    return
  }
  func.func @transform_0(%arg0: i32) -> (i32, i32) {
    %c0_i32 = arith.constant 0 : i32
    %c0_i32_0 = arith.constant 0 : i32
    return %arg0, %c0_i32 : i32, i32
  }
  func.func @transform_1(%arg0: i32) -> (i32, i32) {
    %c0_i32 = arith.constant 0 : i32
    %c0_i32_0 = arith.constant 0 : i32
    %c0_i32_1 = arith.constant 0 : i32
    return %c0_i32, %c0_i32_0 : i32, i32
  }
  func.func @transform_2(%arg0: i32) -> (i32, i32) {
    %c0_i32 = arith.constant 0 : i32
    %c0_i32_0 = arith.constant 0 : i32
    %c0_i32_1 = arith.constant 0 : i32
    return %c0_i32, %c0_i32_0 : i32, i32
  }
  func.func @transform_3(%arg0: i32) -> (i32, i32) {
    %c0_i32 = arith.constant 0 : i32
    %c0_i32_0 = arith.constant 0 : i32
    %c0_i32_1 = arith.constant 0 : i32
    return %c0_i32, %c0_i32_0 : i32, i32
  }
  func.func @transform_4(%arg0: i32) -> (i32, i32) {
    %c0_i32 = arith.constant 0 : i32
    %c0_i32_0 = arith.constant 0 : i32
    %c0_i32_1 = arith.constant 0 : i32
    return %c0_i32, %c0_i32_0 : i32, i32
  }
  func.func @transform_5(%arg0: i32) -> (i32, i32) {
    %c0_i32 = arith.constant 0 : i32
    %c0_i32_0 = arith.constant 0 : i32
    %c0_i32_1 = arith.constant 0 : i32
    return %c0_i32, %c0_i32_0 : i32, i32
  }
  func.func @transform_6(%arg0: i32) -> (i32, i32) {
    %c0_i32 = arith.constant 0 : i32
    %c0_i32_0 = arith.constant 0 : i32
    %c0_i32_1 = arith.constant 0 : i32
    return %c0_i32, %c0_i32_0 : i32, i32
  }
  func.func @transform_7(%arg0: i32) -> (i32, i32) {
    %c0_i32 = arith.constant 0 : i32
    %c0_i32_0 = arith.constant 0 : i32
    return %arg0, %c0_i32 : i32, i32
  }
}

</mosaic_0001>

<bundles_post_ra>
// kernel: tpu_custom_call.1
= control target key start
LH: loop header
LB: loop body
LE: loop exit
PB: predicated region body
PF: predicated region fallthrough
CT: control target
= control target key end

     0   :  { %v361_v0 = vmov 0.0   ;;  %vm362_vm0 = vmmov 0   ;;  %vm38_vm1 = vcmask 261120   ;;  %vm128_vm2 = vcmask 523264   ;;  %s471_s1 = inlined_call_operand.vmem [shape: f32[32,64], index: 1, kind: input, shape index: {}]   ;;  %s472_s3 = inlined_call_operand.vmem [shape: f32[64,32], index: 3, kind: input, shape index: {}]   ;;  %s473_s0 = inlined_call_operand.vmem [shape: f32[8,32], index: 0, kind: input, shape index: {}]   ;;  %s474_s5 = inlined_call_operand.vmem [shape: f32[32,2], index: 5, kind: input, shape index: {}]   ;;  %s475_s2 = inlined_call_operand.vmem [shape: f32[1,64], index: 2, kind: input, shape index: {}]   ;;  %s476_s4 = inlined_call_operand.vmem [shape: f32[1,32], index: 4, kind: input, shape index: {}]   ;;  %s477_s6 = inlined_call_operand.vmem [shape: f32[1,2], index: 6, kind: input, shape index: {}]   ;;  %s478_s7 = inlined_call_operand.vmem [shape: f32[8,2], index: 7, kind: output, shape index: {}]  }
   0x1   :  { %318 = vmatprep.subr.mxu0 %v361_v0  ;;  %v30_v1 = vld [vmem:[%s471_s1 + $0x18] sm:$0xff]  ;;  %v29_v2 = vld [vmem:[%s471_s1 + $0x10] sm:$0xff]  ;;  %326 = vmatprep.mubr.msk.f32.mxu0 %vm362_vm0, %v361_v0  ;;  %v28_v4 = vld [vmem:[%s471_s1 + $0x8] sm:$0xff]  ;;  %vm287_vm3 = vcmask 15360  }
   0x2   :  { %319 = vmatpush3.msra.mxu0 %v30_v1  ;;  %329 = vmatprep.subr.mxu1 %v361_v0  ;;  %v120_v3 = vld [vmem:[%s472_s3 + $0x38] sm:$0xff]  ;;  %v119_v5 = vld [vmem:[%s472_s3 + $0x30] sm:$0xff]  ;;  %v118_v6 = vld [vmem:[%s472_s3 + $0x28] sm:$0xff] }
   0x3   :  { %320 = vmatprep.subr.mxu0 %v361_v0  ;;  %330 = vmatpush3.msra.mxu1 %v120_v3  ;;  %v27_v7 = vld [vmem:[%s471_s1] sm:$0xff]  ;;  %v116_v10 = vld [vmem:[%s472_s3 + $0x18] sm:$0xff]  ;;  %v115_v11 = vld [vmem:[%s472_s3 + $0x10] sm:$0xff] }
   0x4   :  { %321 = vmatpush3.msra.mxu0 %v29_v2  ;;  %331 = vmatprep.subr.mxu1 %v361_v0  ;;  %v26_v8 = vld [vmem:[%s473_s0] sm:$0xff]  ;;  %v114_v12 = vld [vmem:[%s472_s3 + $0x8] sm:$0xff]  ;;  %v206_v14 = vld [vmem:[%s474_s5 + $0x18] sm:$0xff] }
   0x5   :  { %322 = vmatprep.subr.mxu0 %v361_v0  ;;  %332 = vmatpush3.msra.mxu1 %v119_v5  ;;  %v117_v9 = vld [vmem:[%s472_s3 + $0x20] sm:$0xff]  ;;  %v205_v20 = vld [vmem:[%s474_s5 + $0x10] sm:$0xff]  ;;  %v204_v21 = vld [vmem:[%s474_s5 + $0x8] sm:$0xff] }
   0x6   :  { %323 = vmatpush3.msra.mxu0 %v28_v4  ;;  %333 = vmatprep.subr.mxu1 %v361_v0  ;;  %v113_v13 = vld [vmem:[%s472_s3] sm:$0xff] }
   0x7   :  { %324 = vmatprep.subr.mxu0 %v361_v0  ;;  %334 = vmatpush3.msra.mxu1 %v118_v6  ;;  %v293_v15 = vld [vmem:[%s475_s2] ss:$0 sm:$0xff] }
   0x8   :  { %325 = vmatpush3.msra.mxu0 %v27_v7  ;;  %335 = vmatprep.subr.mxu1 %v361_v0  ;;  %v203_v22 = vld [vmem:[%s474_s5] sm:$0xff] }
   0x9   :  { %327 = vmatmul.mubr.msk.f32.vlgmr.msra.gmra.mxu0 %vm38_vm1, %v26_v8  ;;  %336 = vmatpush3.msra.mxu1 %v117_v9  ;;  %v295_v23 = vld [vmem:[%s476_s4] ss:$0 sm:$0xff] }
   0xa   :  { %337 = vmatprep.subr.mxu1 %v361_v0  ;;  %345 = vmatprep.mubr.msk.f32.mxu1 %vm362_vm0, %v361_v0  ;;  %v297_v28 = vld [vmem:[%s477_s6] ss:$0 sm:$0xff] }
   0xb   :  { %338 = vmatpush3.msra.mxu1 %v116_v10  ;;  %348 = vmatprep.subr.mxu0 %v361_v0 }
   0xc   :  { %339 = vmatprep.subr.mxu1 %v361_v0  ;;  %356 = vmatprep.mubr.msk.f32.mxu0 %vm362_vm0, %v361_v0 }
   0xd   :  { %340 = vmatpush3.msra.mxu1 %v115_v11  ;;  %349 = vmatpush3.msra.mxu0 %v206_v14 }
   0xe   :  { %341 = vmatprep.subr.mxu1 %v361_v0  ;;  %350 = vmatprep.subr.mxu0 %v361_v0 }
   0xf   :  { %342 = vmatpush3.msra.mxu1 %v114_v12  ;;  %351 = vmatpush3.msra.mxu0 %v205_v20 }
  0x10   :  { %343 = vmatprep.subr.mxu1 %v361_v0  ;;  %352 = vmatprep.subr.mxu0 %v361_v0 }
  0x11   :  { %344 = vmatpush3.msra.mxu1 %v113_v13  ;;  %353 = vmatpush3.msra.mxu0 %v204_v21 }
  0x12   :  { %354 = vmatprep.subr.mxu0 %v361_v0 }
  0x13   :  { %355 = vmatpush3.msra.mxu0 %v203_v22 }
  0xc9   :  { %v108_v16 = vpop.f32.mrf.mxu0 }
  0xca   :  { %v109_v17 = vadd.f32 %v293_v15, %v108_v16 }
  0xcb   :  { %v328_v18 = vpop.f32.mrf.mxu0 }
  0xcc   :  { %v112_v19 = vmax.f32 %v109_v17, 0.0 }
  0xce   :  { %346 = vmatmul.mubr.msk.f32.vlgmr.msra.gmra.mxu1 %vm128_vm2, %v112_v19 }
 0x18e   :  { %v198_v24 = vpop.f32.mrf.mxu1 }
 0x18f   :  { %v199_v25 = vadd.f32 %v295_v23, %v198_v24 }
 0x190   :  { %v347_v26 = vpop.f32.mrf.mxu1 }
 0x191   :  { %v202_v27 = vmax.f32 %v199_v25, 0.0 }
 0x193   :  { %357 = vmatmul.mubr.msk.f32.vlgmr.msra.gmra.mxu0 %vm38_vm1, %v202_v27 }
 0x253   :  { %v283_v29 = vpop.f32.mrf.mxu0 }
 0x254   :  { %v284_v30 = vadd.f32 %v297_v28, %v283_v29 }
 0x255   :  { %v358_v31 = vpop.f32.mrf.mxu0 }
 0x256   :  { %288 = vst.msk [vmem:[%s478_s7] sm:$0xff] %vm287_vm3, %v284_v30 }

</bundles_post_ra>
